<compile_context>
chip_gen: v7x
topology: tpu7x:2x2x1
jax: 0.10.0
libtpu: 0.0.40
codegen_flags: <defaults>
</compile_context>

<pallas_src>
import functools
from dataclasses import dataclass

import jax
import jax.numpy as jnp
from jax import lax
from jax.experimental import pallas as pl
from jax.experimental.pallas import tpu as pltpu


@dataclass
class Config:
    hidden_size: int = 32
    initializer_range: float = 0.02


def _router_kernel(x_ref, w_ref, o_ref, *, compute_dtype):
    # x_ref: (TM, H)  w_ref: (O, H)  o_ref: (O, TM)   [lane-dense output]
    x = x_ref[...]
    w = w_ref[...]
    if compute_dtype is not None:
        # Opt-in low-precision compute: cast on the VPU, inside the kernel,
        # so HBM only ever sees the native-dtype x.
        x = x.astype(compute_dtype)
        w = w.astype(compute_dtype)
    acc = lax.dot_general(
        w,
        x,
        dimension_numbers=(((1,), (1,)), ((), ())),  # contract on hidden dim
        preferred_element_type=jnp.float32,
    )  # -> (O, TM)
    o_ref[...] = acc.astype(o_ref.dtype)


def linear_router(
    x,
    weight,
    *,
    compute_dtype=None,          # None = native dtype (exact nn.Linear semantics)
    block_tokens=None,           # None = auto (~2 MiB x tile)
    vmem_budget_bytes: int = 40 * 1024 * 1024,   # double-buffered working set,
                                                 # safe per-TC on v7x (64 MiB)
    use_pallas=None,             # None = auto-gate on problem size
):
    """out = x @ weight.T, x: (B, S, H), weight: (O, H) -> (B, S, O)."""
    b, s, h = x.shape
    out_dim, h_w = weight.shape
    assert h == h_w, "hidden_size mismatch between x and weight"
    out_dtype = x.dtype
    t = b * s

    xbytes = jnp.dtype(x.dtype).itemsize
    wbytes = jnp.dtype(weight.dtype).itemsize
    obytes = jnp.dtype(out_dtype).itemsize

    if use_pallas is None:
        # Toy problems: let XLA fuse it; kernel launch/DMA setup dwarfs ~KFLOPs.
        use_pallas = (t * h * xbytes) >= (4 << 20)
    if not use_pallas:
        return jnp.einsum("bsh,oh->bso", x, weight).astype(out_dtype)

    # ---- Tile sizing ------------------------------------------------------
    # Target: x tile ~2 MiB (amortizes the ~0.35 us/grid-step overhead, lands
    # in the 85%+-of-HBM-roofline regime), capped by the VMEM working-set
    # budget: 2x x-tile + 2x out-tile (double-buffered) + 2x resident weight.
    if block_tokens is None:
        tm = max(512, (2 << 20) // (h * xbytes))
    else:
        tm = int(block_tokens)
    w_bytes = 2 * out_dim * h * wbytes
    per_row = 2 * (h * xbytes + out_dim * obytes)
    budget = max(vmem_budget_bytes - w_bytes, 128 * per_row)
    tm_cap = max(128, (budget // per_row) // 128 * 128)
    tm = min(tm, tm_cap)
    tm = max(128, tm // 128 * 128)   # multiple of 128: lane-dense out stores
    if tm >= t:
        tm = t                        # single block == full token extent

    num_tiles = pl.cdiv(t, tm)        # ragged last block is masked by Pallas

    working_set = 2 * tm * h * xbytes + 2 * out_dim * tm * obytes + w_bytes
    vmem_limit = int(min(max(2 * working_set, 16 << 20), 48 << 20))

    x2d = x.reshape(t, h)             # free reshape, native dtype, no copy

    cost = pl.CostEstimate(
        flops=2 * t * h * out_dim,
        transcendentals=0,
        bytes_accessed=t * h * xbytes + out_dim * h * wbytes
        + t * out_dim * obytes,
    )

    kernel = functools.partial(_router_kernel, compute_dtype=compute_dtype)

    out_ot = pl.pallas_call(
        kernel,
        out_shape=jax.ShapeDtypeStruct((out_dim, t), out_dtype),
        grid_spec=pltpu.PrefetchScalarGridSpec(
            num_scalar_prefetch=0,
            grid=(num_tiles,),
            in_specs=[
                # x: tiled over tokens -> double-buffered pipeline.
                pl.BlockSpec((tm, h), lambda i: (i, 0)),
                # weight: constant block index -> fetched once, VMEM-resident.
                pl.BlockSpec((out_dim, h), lambda i: (0, 0)),
            ],
            # Lane-dense output tile (O, TM): unmasked vector stores.
            out_specs=pl.BlockSpec((out_dim, tm), lambda i: (0, i)),
        ),
        compiler_params=pltpu.CompilerParams(
            # Independent token tiles: v7x shards the grid across its 2 TCs.
            dimension_semantics=("parallel",),
            vmem_limit_bytes=vmem_limit,
        ),
        cost_estimate=cost,
    )(x2d, weight)

    # (O, T) -> (B, S, O); for out_dim == 1 the transpose is effectively free.
    return out_ot.T.reshape(b, s, out_dim)


if __name__ == "__main__":
    cfg = Config(hidden_size=32, initializer_range=0.02)
    out_dim = 1
    batch, seq = 2, 8

    key = jax.random.PRNGKey(0)
    kx, kw = jax.random.split(key)

    x = jax.random.normal(kx, (batch, seq, cfg.hidden_size), dtype=jnp.float32)
    # Deterministic weight init mirroring .normal_(mean=0.0, std=initializer_range)
    weight = (
        jax.random.normal(kw, (out_dim, cfg.hidden_size), dtype=jnp.float32)
        * cfg.initializer_range
    )

    ref = jnp.einsum("bsh,oh->bso", x, weight)

    # Native f32 path through the Pallas kernel (exact nn.Linear semantics).
    out_f32 = jax.block_until_ready(linear_router(x, weight, use_pallas=True))
    assert out_f32.shape == (batch, seq, out_dim)
    assert jnp.allclose(out_f32, ref, atol=1e-4, rtol=1e-4)

    # bf16 opt-in compute path (in-kernel cast, f32 accumulation).
    out_bf16 = jax.block_until_ready(
        linear_router(x, weight, compute_dtype=jnp.bfloat16, use_pallas=True)
    )
    assert out_bf16.shape == (batch, seq, out_dim)
    assert jnp.allclose(out_bf16, ref, atol=1e-2, rtol=2e-2)

    # Multi-tile run: grid > 1, ragged last block (no wrapper pad), lane-dense
    # output writeback.
    batch2, seq2 = 4, 515   # 2060 tokens: 8 full 256-token tiles + ragged 12
    x2 = jax.random.normal(kx, (batch2, seq2, cfg.hidden_size), dtype=jnp.float32)
    out2 = jax.block_until_ready(
        linear_router(x2, weight, use_pallas=True, block_tokens=256)
    )
    ref2 = jnp.einsum("bsh,oh->bso", x2, weight)
    assert out2.shape == (batch2, seq2, out_dim)
    assert jnp.allclose(out2, ref2, atol=1e-4, rtol=1e-4)

    # Auto-gated path: toy shape falls back to the fused einsum.
    out_auto = jax.block_until_ready(linear_router(x, weight))
    assert jnp.allclose(out_auto, ref, atol=1e-5, rtol=1e-5)

    print("KERNEL_OK")
</pallas_src>

<mosaic_0001>
module attributes {stable_mosaic.version = 11 : i64} {
  func.func @_router_kernel(%arg0: i32, %arg1: memref<16x32xf32, #tpu.memory_space<vmem>>, %arg2: memref<1x32xf32, #tpu.memory_space<vmem>>, %arg3: memref<1x16xf32, #tpu.memory_space<vmem>>) attributes {dimension_semantics = [#tpu.dimension_semantics<parallel>], iteration_bounds = array<i64: 1>, scalar_prefetch = 0 : i64, scratch_operands = 0 : i64, tpu.core_type = #tpu.core_type<tc>, window_params = [{transform_indices = @transform_0, window_bounds = array<i64: 16, 32>}, {pipeline_mode = #tpu.pipeline_mode<synchronous>, transform_indices = @transform_1, window_bounds = array<i64: 1, 32>}, {transform_indices = @transform_2, window_bounds = array<i64: 1, 16>}]} {
    %c0 = arith.constant 0 : index
    %c0_0 = arith.constant 0 : index
    %0 = vector.load %arg1[%c0, %c0_0] : memref<16x32xf32, #tpu.memory_space<vmem>>, vector<16x32xf32>
    %c0_1 = arith.constant 0 : index
    %c0_2 = arith.constant 0 : index
    %1 = vector.load %arg2[%c0_1, %c0_2] : memref<1x32xf32, #tpu.memory_space<vmem>>, vector<1x32xf32>
    %cst = arith.constant dense<0.000000e+00> : vector<1x16xf32>
    %2 = tpu.matmul %1, %0, %cst {dimension_numbers = #tpu.dot_dimension_numbers<[1], [1], [0], [0], [0, 0, 1, 0], [], []>} : vector<1x32xf32>, vector<16x32xf32>, vector<1x16xf32> -> vector<1x16xf32>
    %c0_3 = arith.constant 0 : index
    %c0_4 = arith.constant 0 : index
    %3 = vector.load %arg3[%c0_3, %c0_4] : memref<1x16xf32, #tpu.memory_space<vmem>>, vector<1x16xf32>
    tpu.vector_store %arg3[%c0_3, %c0_4], %2 {strides = array<i32>} : memref<1x16xf32, #tpu.memory_space<vmem>>, vector<1x16xf32>,
    return
  }
  func.func @transform_0(%arg0: i32) -> (i32, i32) {
    %c0_i32 = arith.constant 0 : i32
    %c0_i32_0 = arith.constant 0 : i32
    return %arg0, %c0_i32 : i32, i32
  }
  func.func @transform_1(%arg0: i32) -> (i32, i32) {
    %c0_i32 = arith.constant 0 : i32
    %c0_i32_0 = arith.constant 0 : i32
    %c0_i32_1 = arith.constant 0 : i32
    return %c0_i32, %c0_i32_0 : i32, i32
  }
  func.func @transform_2(%arg0: i32) -> (i32, i32) {
    %c0_i32 = arith.constant 0 : i32
    %c0_i32_0 = arith.constant 0 : i32
    return %c0_i32, %arg0 : i32, i32
  }
}

</mosaic_0001>

<bundles_post_ra>
// kernel: tpu_custom_call.1
= control target key start
LH: loop header
LB: loop body
LE: loop exit
PB: predicated region body
PF: predicated region fallthrough
CT: control target
= control target key end

     0   :  { %7 = vsyncpa [#allocation3], 0  ;;  %s247_s0 = inlined_call_operand.hbm [shape: f32[16,32], index: 0, kind: input, shape index: {}]   ;;  %s248_s1 = inlined_call_operand.vmem [shape: f32[1,32], index: 1, kind: input, shape index: {}]   ;;  %s249_s2 = inlined_call_operand.hbm [shape: f32[1,16], index: 2, kind: output, shape index: {}]  }
   0x1   :  { %8 = vsyncpa [#allocation4], 0  ;;  %s198_s9 = smov [#allocation2]   ;;  %s150_s13 = scalar_lea.hbm %s247_s0, 256 }
   0x2   :  { %s14_s10 = sshll.u32 %s198_s9, 4  ;;  %p151_p0 = scmp.ne.s32.totalorder %s247_s0, %s150_s13  ;;  %s15_s10 = int_to_ptr.vmem [resolvable:$true] %s14_s10 }
   0x3   :  { %p154_p1 = scmp.lt.u32.totalorder %s150_s13, %s247_s0 }
   0x5   :  { %p156_p2 = pnand %p154_p1, %p151_p0 }
   0x7   :  { %159 = shalt.err (!%p156_p2)
}
   0x8   :  { %s160_s18 = scalar_lea.vmem %s15_s10, 256  ;;  %p165_p4 = scmp.lt.s32.totalorder %s15_s10, %s15_s10 }
   0x9   :  { %p161_p3 = scmp.ne.s32.totalorder %s15_s10, %s160_s18  ;;  %p166_p5 = scmp.lt.s32.totalorder %s160_s18, %s160_s18 }
   0xb   :  { %p167_p6 = por %p166_p5, %p165_p4 }
   0xd   :  { %p168_p7 = pnand %p167_p6, %p161_p3 }
   0xf   :  { %171 = shalt.err (!%p168_p7)
}
  0x10   :  { %s199_s19 = smov 128   ;;  %s200_s20 = smov 8  }
  0x11   :  { %20 = dma.hbm_to_vmem [thread:$0]  %s247_s0, 256, %s15_s10, [#allocation3], %s199_s19, %s199_s19, %s200_s20  }
  0x12   :  { %194 = dma.done.wait [#allocation3], 256  }
  0x13   :  { %195 = vsyncadd [#allocation3], 4294967040  ;;  %v201_v0 = vmov 0.0|0.0   ;;  %vm202_vm0 = vmmov 0   ;;  %v203_v1 = vmov 0.0   ;;  %vm29_vm1 = vcmask 261120  }
  0x14   :  { %139 = vmatprep.subr.bf16.mxu0 %v201_v0  ;;  %136 = vmatprep.mubr.msk.f32.mxu0 %vm202_vm0, %v203_v1  ;;  %v26_v2 = vld [vmem:[#allocation2] sm:$0xff]  ;;  %v27_v3 = vld [vmem:[#allocation2 + $0x8] sm:$0xff]  ;;  %vm141_vm2 = vmpackc.low %vm29_vm1, %vm29_vm1  ;;  %s204_s25 = smov [#allocation5]   ;;  %vm109_vm3 = vcmask 122880  }
  0x15   :  { %v140_v4 = vpack.c.bf16 %v27_v3, %v26_v2  ;;  %v28_v5 = vld [vmem:[%s248_s1] sm:$0x1]  ;;  %s117_s0 = sshll.u32 %s204_s25, 4  ;;  %s118_s0 = int_to_ptr.vmem [resolvable:$true] %s117_s0 }
  0x16   :  { %s172_s26 = scalar_lea.vmem %s118_s0, 16  ;;  %s176_s27 = scalar_lea.vmem %s118_s0, 32 }
  0x17   :  { %142 = vmatpush3.bf16.xpose.msk.msra.mxu0 %vm141_vm2, %v140_v4  ;;  %p173_p8 = scmp.ne.s32.totalorder %s118_s0, %s172_s26  ;;  %p177_p9 = scmp.lt.s32.totalorder %s118_s0, %s118_s0 }
  0x18   :  { %p178_p10 = scmp.lt.s32.totalorder %s176_s27, %s172_s26 }
  0x1a   :  { %p179_p11 = por %p178_p10, %p177_p9 }
  0x1c   :  { %p180_p12 = pnand %p179_p11, %p173_p8 }
  0x1e   :  { %137 = vmatmul.mubr.msk.f32.vlgmr.msra.gmra.mrb[0].mxu0 %vm29_vm1, %v28_v5 }
  0xf1   :  { %v105_v6 = vpop.f32.mrb[0].mxu0 }
  0xf2   :  { %v138_v7 = vpop.f32.mrb[1].mxu0  ;;  %110 = vst.msk [vmem:[#allocation5] sm:$0x1] %vm109_vm3, %v105_v6 }
  0xf3   :  { %183 = shalt.err (!%p180_p12)
}
  0xf4   :  { %s184_s1 = scalar_lea.hbm %s249_s2, 16 }
  0xf5   :  { %p185_p13 = scmp.ne.s32.totalorder %s249_s2, %s184_s1  ;;  %p188_p0 = scmp.lt.u32.totalorder %s184_s1, %s249_s2 }
  0xf7   :  { %p190_p1 = pnand %p188_p0, %p185_p13 }
  0xf9   :  { %193 = shalt.err (!%p190_p1)
}
  0xfa   :  { %120 = dma.vmem_to_hbm [thread:$0]  %s118_s0, 16, %s249_s2, [#allocation4]  }
  0xfb   :  { %196 = dma.done.wait [#allocation4], 16  }
  0xfc   :  { %197 = vsyncadd [#allocation4], 4294967280 }
  0xfd   :  { %124 = vsyncpa [#allocation3], 1 }
  0xfe   :  { %125 = vsyncpa [#allocation4], 1 }

</bundles_post_ra>
